<compile_context>
chip_gen: v7x
topology: tpu7x:2x2x1
jax: 0.10.0
libtpu: 0.0.40
codegen_flags: <defaults>
</compile_context>

<pallas_src>
import functools

import jax
import jax.numpy as jnp
from jax.experimental import pallas as pl
from jax.experimental.pallas import tpu as pltpu


# ---------------------------------------------------------------------------
# Kernel
# ---------------------------------------------------------------------------
def _decoder_kernel(x_ref, w1_ref, b1_ref, w2_ref, b2_ref, mtop_ref, mbot_ref, o_ref,
                    *, up_shift, dn_shift):
    """One row block: two banded 3x3 convs (BN folded into weights/bias), ReLU in between.

    x_ref:        (R, L)  activations, compute dtype (R = Gb*H rows, L = P*W*C lanes)
    w*_ref:       (3L, L) row-stacked banded weights [row-1; row; row+1], BN scale folded
    b*_ref:       (1, L)  folded BN bias (f32)
    mtop/mbot:    (R, 1)  f32 0/1 masks killing rows that crossed an image boundary
    o_ref:        (R, L)  f32 output
    """
    x = x_ref[...]
    not_top = mtop_ref[...]
    not_bot = mbot_ref[...]

    def shifted_taps(v):
        # Row r of `up` holds row r-1 of v (zeroed at the top row of each image); row r of
        # `dn` holds row r+1 (zeroed at the bottom row).  Shifts run on an f32 copy (plain
        # 32-bit sublane rotate); values are unchanged, so operands stay exactly bf16(v).
        vf = v.astype(jnp.float32)
        up = (pltpu.roll(vf, shift=up_shift, axis=0) * not_top).astype(v.dtype)
        dn = (pltpu.roll(vf, shift=dn_shift, axis=0) * not_bot).astype(v.dtype)
        return jnp.concatenate([up, v, dn], axis=-1)           # (R, 3L)

    def conv(v, w_ref, b_ref):
        taps = shifted_taps(v)
        acc = jnp.dot(taps, w_ref[...], preferred_element_type=jnp.float32)
        return acc + b_ref[...]                                 # f32 bias add

    y = jnp.maximum(conv(x, w1_ref, b1_ref), 0.0)               # conv1 + BN + ReLU (f32)
    out = conv(y.astype(x.dtype), w2_ref, b2_ref)               # conv2 + BN
    o_ref[...] = out.astype(o_ref.dtype)


@functools.cache
def _roll_shifts_forward() -> bool:
    """One-time self-check of pltpu.roll's sign convention (expected: jnp.roll-compatible,
    i.e. shift=+1 moves row r to row r+1)."""
    def probe(x_ref, o_ref):
        o_ref[...] = pltpu.roll(x_ref[...], shift=1, axis=0)

    x = jnp.zeros((8, 128), jnp.float32).at[1, 0].set(1.0)
    y = pl.pallas_call(probe, out_shape=jax.ShapeDtypeStruct((8, 128), jnp.float32))(x)
    return bool(y[2, 0] == 1.0)


# ---------------------------------------------------------------------------
# Wrapper-side parameter / layout prep
# ---------------------------------------------------------------------------
def _fold_bn(bn, eps):
    scale = bn["gamma"] / jnp.sqrt(bn["var"] + eps)
    bias = bn["beta"] - bn["mean"] * scale
    return scale.astype(jnp.float32), bias.astype(jnp.float32)


def _band_weights(w_hwio, scale, W, P, dtype):
    """BN-folded, banded, block-diagonal, row-stacked weights: (3*P*W*C, P*W*C).

    band[kh][wi*C+ci, wo*C+co] = w[kh, kw, ci, co]*scale[co] with wi = wo + kw - 1 (zero
    elsewhere, which also encodes SAME zero padding along W).  Block-diagonal over the P
    lane-packed images; the 3 kh bands are stacked along the contraction axis in the
    order [row-1, row, row+1] to match the kernel's tap concatenation.
    """
    C = w_hwio.shape[-1]
    wf = w_hwio.astype(jnp.float32) * scale.reshape(1, 1, 1, C)
    eye_p = jnp.eye(P, dtype=jnp.float32)
    bands = []
    for kh in range(3):
        bk = jnp.zeros((W * C, W * C), jnp.float32)
        for kw in range(3):
            shift = jnp.eye(W, k=1 - kw, dtype=jnp.float32)    # selects wi == wo + kw - 1
            bk = bk + jnp.kron(shift, wf[kh, kw])
        bands.append(jnp.kron(eye_p, bk))                      # (L, L) block-diag over images
    return jnp.concatenate(bands, axis=0).astype(dtype)        # (3L, L)


def _pack_input(x_nchw, r, P, dtype):
    """pixel_shuffle(x, r) -> lane-packed 2-D slab (G*H, P*W*C).

    row = g*H + h ; lane = p*(W*C) + w*C + c ; image n = g*P + p.
    One fused transpose/reshape pass (no separate NHWC transpose or padding pass).
    """
    N, Crr, H0, W0 = x_nchw.shape
    C = Crr // (r * r)
    G = N // P
    x = x_nchw.reshape(G, P, C, r, r, H0, W0)
    x = x.transpose(0, 5, 3, 1, 6, 4, 2)                       # G, H0, r1, P, W0, r2, C
    return x.reshape(G * H0 * r, P * W0 * r * C).astype(dtype)


def _unpack_output(out2d, N, C, H, W, P):
    G = N // P
    out = out2d.reshape(G, H, P, W, C)
    out = out.transpose(0, 2, 4, 1, 3)                         # G, P, C, H, W
    return out.reshape(N, C, H, W)


def _pick_lane_pack(N, WC, target_lanes=128):
    """Images packed along lanes so the working lane width is ~128."""
    p = max(1, min(N, target_lanes // max(1, WC)))
    while N % p:
        p -= 1
    return p


def _pick_group_block(G, H, target_rows=256):
    """Images (lane-groups) per grid step: ~256 rows, >= 2 grid steps when possible."""
    gb = max(1, min(G, max(1, target_rows // H)))
    if G >= 2:
        gb = max(1, min(gb, G // 2))          # keep >=2 steps so v7x's 2 TCs both get work
    while gb > 1 and (G % gb or (gb * H) % 8):
        gb -= 1
    if (gb * H) % 8:
        gb = G                                 # full-extent block satisfies the tiling rule
    return gb


# ---------------------------------------------------------------------------
# Public entry point
# ---------------------------------------------------------------------------
def decoder_block(x_nchw, w1, w2, bn1, bn2, eps=1e-5, compute_dtype=jnp.bfloat16):
    """Forward pass of DecoderBlock.

    x_nchw: (N, planes, H0, W0); w*: (3, 3, C, C) HWIO with C = planes // 4;
    bn*: dict(gamma, beta, mean, var) of (C,).  Returns NCHW f32 (N, C, 2*H0, 2*W0).
    """
    N, planes, H0, W0 = x_nchw.shape
    r = 2
    assert planes % (r * r) == 0, planes
    C = planes // (r * r)
    H, W = H0 * r, W0 * r
    WC = W * C

    P = _pick_lane_pack(N, WC)                 # images packed along lanes
    L = P * WC
    G = N // P
    Gb = _pick_group_block(G, H)               # images per grid step
    R = Gb * H                                 # rows per grid step
    grid = (G // Gb,)

    # ---- one-time parameter prep (BN folded into weights/bias, banded weights) ----
    s1, b1 = _fold_bn(bn1, eps)
    s2, b2 = _fold_bn(bn2, eps)
    w1b = _band_weights(w1, s1, W, P, compute_dtype)           # (3L, L)
    w2b = _band_weights(w2, s2, W, P, compute_dtype)
    b1f = jnp.tile(b1, P * W).reshape(1, L)                    # f32 per-lane bias
    b2f = jnp.tile(b2, P * W).reshape(1, L)

    rloc = jnp.arange(R, dtype=jnp.int32) % H
    mtop = (rloc != 0).astype(jnp.float32).reshape(R, 1)       # 0 at top row of each image
    mbot = (rloc != H - 1).astype(jnp.float32).reshape(R, 1)   # 0 at bottom row

    x2d = _pack_input(x_nchw, r, P, compute_dtype)             # (G*H, L)

    forward = _roll_shifts_forward()
    up_shift, dn_shift = (1, R - 1) if forward else (R - 1, 1)
    kernel = functools.partial(_decoder_kernel, up_shift=up_shift, dn_shift=dn_shift)

    out2d = pl.pallas_call(
        kernel,
        out_shape=jax.ShapeDtypeStruct((G * H, L), jnp.float32),
        grid_spec=pltpu.PrefetchScalarGridSpec(
            num_scalar_prefetch=0,
            grid=grid,
            in_specs=[
                pl.BlockSpec((R, L), lambda i: (i, 0)),        # activations
                pl.BlockSpec((3 * L, L), lambda i: (0, 0)),    # conv1 weights (resident)
                pl.BlockSpec((1, L), lambda i: (0, 0)),        # conv1 bias
                pl.BlockSpec((3 * L, L), lambda i: (0, 0)),    # conv2 weights (resident)
                pl.BlockSpec((1, L), lambda i: (0, 0)),        # conv2 bias
                pl.BlockSpec((R, 1), lambda i: (0, 0)),        # top-of-image mask
                pl.BlockSpec((R, 1), lambda i: (0, 0)),        # bottom-of-image mask
            ],
            out_specs=pl.BlockSpec((R, L), lambda i: (i, 0)),
        ),
        compiler_params=pltpu.CompilerParams(
            dimension_semantics=("parallel",),
            vmem_limit_bytes=32 * 1024 * 1024,
        ),
    )(x2d, w1b, b1f, w2b, b2f, mtop, mbot)

    # Module contract is NCHW; if a downstream consumer accepted the packed layout this
    # final transpose (a separate HBM pass) could be dropped.
    return _unpack_output(out2d, N, C, H, W, P)


# ---------------------------------------------------------------------------
# Pure-JAX reference
# ---------------------------------------------------------------------------
def _pixel_shuffle_nchw(x, r):
    N, Crr, Hh, Ww = x.shape
    C = Crr // (r * r)
    x = x.reshape(N, C, r, r, Hh, Ww)
    x = x.transpose(0, 1, 4, 2, 5, 3)
    return x.reshape(N, C, Hh * r, Ww * r)


def _reference(x_nchw, w1, w2, bn1, bn2, eps=1e-5, operand_dtype=jnp.float32):
    """f32 reference.  With operand_dtype=bf16 the conv operands are rounded exactly like
    the kernel's MXU operands (accumulation, bias, ReLU stay f32)."""
    r = 2
    x = jnp.transpose(_pixel_shuffle_nchw(x_nchw, r), (0, 2, 3, 1)).astype(jnp.float32)
    dn = ("NHWC", "HWIO", "NHWC")
    q = lambda a: a.astype(operand_dtype).astype(jnp.float32)

    def fold(bn):
        scale = bn["gamma"] / jnp.sqrt(bn["var"] + eps)
        return scale, bn["beta"] - bn["mean"] * scale

    s1, b1 = fold(bn1)
    s2, b2 = fold(bn2)
    conv = functools.partial(jax.lax.conv_general_dilated, window_strides=(1, 1),
                             padding="SAME", dimension_numbers=dn,
                             precision=jax.lax.Precision.HIGHEST)
    y = conv(q(x), q(w1 * s1.reshape(1, 1, 1, -1))) + b1
    y = jnp.maximum(y, 0.0)
    out = conv(q(y), q(w2 * s2.reshape(1, 1, 1, -1))) + b2
    return jnp.transpose(out, (0, 3, 1, 2))


if __name__ == "__main__":
    # planes = 16  ->  internal channels C = planes // 4 = 4
    N, planes, H0, W0 = 2, 16, 8, 8
    C = planes // 4

    key = jax.random.PRNGKey(0)
    kx, kw1, kw2 = jax.random.split(key, 3)

    x = jax.random.normal(kx, (N, planes, H0, W0), dtype=jnp.float32)
    w1 = 0.1 * jax.random.normal(kw1, (3, 3, C, C), dtype=jnp.float32)   # HWIO, bias=False
    w2 = 0.1 * jax.random.normal(kw2, (3, 3, C, C), dtype=jnp.float32)

    ar = jnp.arange(C, dtype=jnp.float32)
    bn1 = dict(gamma=1.0 + 0.1 * ar, beta=0.01 * ar, mean=0.05 * ar, var=1.0 + 0.02 * ar)
    bn2 = dict(gamma=1.0 - 0.05 * ar, beta=-0.02 * ar, mean=-0.03 * ar, var=1.0 + 0.04 * ar)

    out = jax.block_until_ready(decoder_block(x, w1, w2, bn1, bn2))
    assert out.shape == (N, C, H0 * 2, W0 * 2), out.shape

    # Tight check: same math with matched bf16 operand rounding (only accumulation order differs).
    ref_matched = _reference(x, w1, w2, bn1, bn2, operand_dtype=jnp.bfloat16)
    err_m = float(jnp.max(jnp.abs(out - ref_matched)))
    assert jnp.allclose(out, ref_matched, rtol=2e-3, atol=2e-3), err_m

    # Loose check: pure f32 module math (bf16 operand rounding is the only gap).
    ref_f32 = _reference(x, w1, w2, bn1, bn2, operand_dtype=jnp.float32)
    err_f = float(jnp.max(jnp.abs(out - ref_f32)))
    assert jnp.allclose(out, ref_f32, rtol=5e-2, atol=5e-2), err_f

    print("KERNEL_OK")
</pallas_src>

<mosaic_0001>
module attributes {stable_mosaic.version = 11 : i64} {
  func.func @probe(%arg0: memref<8x128xf32, #tpu.memory_space<vmem>>, %arg1: memref<8x128xf32, #tpu.memory_space<vmem>>) attributes {dimension_semantics = [], scalar_prefetch = 0 : i64, scratch_operands = 0 : i64, tpu.core_type = #tpu.core_type<tc>} {
    %c0 = arith.constant 0 : index
    %c0_0 = arith.constant 0 : index
    %0 = vector.load %arg0[%c0, %c0_0] : memref<8x128xf32, #tpu.memory_space<vmem>>, vector<8x128xf32>
    %c1_i32 = arith.constant 1 : i32
    %1 = tpu.dynamic_rotate %0 by %c1_i32 dim 0 : vector<8x128xf32>, i32 -> vector<8x128xf32>
    %c0_1 = arith.constant 0 : index
    %c0_2 = arith.constant 0 : index
    %2 = vector.load %arg1[%c0_1, %c0_2] : memref<8x128xf32, #tpu.memory_space<vmem>>, vector<8x128xf32>
    tpu.vector_store %arg1[%c0_1, %c0_2], %1 {strides = array<i32>} : memref<8x128xf32, #tpu.memory_space<vmem>>, vector<8x128xf32>,
    return
  }
}

</mosaic_0001>

<bundles_post_ra>
// kernel: tpu_custom_call.1
= control target key start
LH: loop header
LB: loop body
LE: loop exit
PB: predicated region body
PF: predicated region fallthrough
CT: control target
= control target key end

     0   :  { %6 = vsyncpa [#allocation3], 0  ;;  %s125_s0 = inlined_call_operand.hbm [shape: f32[8,128], index: 0, kind: input, shape index: {}]   ;;  %s126_s1 = inlined_call_operand.hbm [shape: f32[8,128], index: 1, kind: output, shape index: {}]  }
   0x1   :  { %7 = vsyncpa [#allocation4], 0  ;;  %s89_s6 = smov [#allocation2]   ;;  %s41_s10 = scalar_lea.hbm %s125_s0, 128 }
   0x2   :  { %s14_s7 = sshll.u32 %s89_s6, 4  ;;  %p42_p0 = scmp.ne.s32.totalorder %s125_s0, %s41_s10  ;;  %s15_s7 = int_to_ptr.vmem [resolvable:$true] %s14_s7 }
   0x3   :  { %p45_p1 = scmp.lt.u32.totalorder %s41_s10, %s125_s0 }
   0x5   :  { %p47_p2 = pnand %p45_p1, %p42_p0 }
   0x7   :  { %50 = shalt.err (!%p47_p2)
}
   0x8   :  { %s51_s15 = scalar_lea.vmem %s15_s7, 128  ;;  %p56_p4 = scmp.lt.s32.totalorder %s15_s7, %s15_s7 }
   0x9   :  { %p52_p3 = scmp.ne.s32.totalorder %s15_s7, %s51_s15  ;;  %p57_p5 = scmp.lt.s32.totalorder %s51_s15, %s51_s15 }
   0xb   :  { %p58_p6 = por %p57_p5, %p56_p4 }
   0xd   :  { %p59_p7 = pnand %p58_p6, %p52_p3 }
   0xf   :  { %62 = shalt.err (!%p59_p7)
}
  0x10   :  { %17 = dma.hbm_to_vmem [thread:$0]  %s125_s0, 128, %s15_s7, [#allocation3]  }
  0x11   :  { %85 = dma.done.wait [#allocation3], 128  }
  0x12   :  { %86 = vsyncadd [#allocation3], 4294967168  ;;  %s90_s18 = smov [#allocation5]   ;;  %v21_v0 = vld [vmem:[#allocation2] sm:$0xff] }
  0x13   :  { %s30_s19 = sshll.u32 %s90_s18, 4  ;;  %v22_v1 = vrot.slane %v21_v0, 7  ;;  %s31_s19 = int_to_ptr.vmem [resolvable:$true] %s30_s19 }
  0x14   :  { %s63_s20 = scalar_lea.vmem %s31_s19, 128  ;;  %p68_p9 = scmp.lt.s32.totalorder %s31_s19, %s31_s19 }
  0x15   :  { %23 = vst [vmem:[#allocation5] sm:$0xff] %v22_v1  ;;  %p64_p8 = scmp.ne.s32.totalorder %s31_s19, %s63_s20  ;;  %p69_p10 = scmp.lt.s32.totalorder %s63_s20, %s63_s20 }
  0x17   :  { %p70_p11 = por %p69_p10, %p68_p9 }
  0x19   :  { %p71_p12 = pnand %p70_p11, %p64_p8 }
  0x1b   :  { %74 = shalt.err (!%p71_p12)
}
  0x1c   :  { %s75_s23 = scalar_lea.hbm %s126_s1, 128 }
  0x1d   :  { %p76_p13 = scmp.ne.s32.totalorder %s126_s1, %s75_s23  ;;  %p79_p0 = scmp.lt.u32.totalorder %s75_s23, %s126_s1 }
  0x1f   :  { %p81_p1 = pnand %p79_p0, %p76_p13 }
  0x21   :  { %84 = shalt.err (!%p81_p1)
}
  0x22   :  { %33 = dma.vmem_to_hbm [thread:$0]  %s31_s19, 128, %s126_s1, [#allocation4]  }
  0x23   :  { %87 = dma.done.wait [#allocation4], 128  }
  0x24   :  { %88 = vsyncadd [#allocation4], 4294967168 }
  0x25   :  { %37 = vsyncpa [#allocation3], 1 }
  0x26   :  { %38 = vsyncpa [#allocation4], 1 }

</bundles_post_ra>
